<compile_context>
chip_gen: v7x
topology: tpu7x:2x2x1
jax: 0.10.0
libtpu: 0.0.40
codegen_flags: <defaults>
</compile_context>

<pallas_src>
import functools

import jax
import jax.numpy as jnp
from jax import lax
from jax.experimental import pallas as pl
from jax.experimental.pallas import tpu as pltpu

_LANE = 128                       # TPU vreg lane width
_MAX_TILE_N = 8192                # batch columns per grid step (amortizes step overhead)
_VMEM_LIMIT = 48 * 1024 * 1024    # double-buffered tiles ~18 MiB at tn=8192; headroom on v7x


def _round_up(a: int, b: int) -> int:
    return -(-a // b) * b


def _default_compute_dtype():
    """bf16 VPU/EUP path on v6e / v7x; f32 on v5e and older (no bf16 VPU/EUP)."""
    try:
        kind = jax.devices()[0].device_kind.lower()
    except Exception:
        return jnp.float32
    if any(tag in kind for tag in ("v6", "v7", "7x")):
        return jnp.bfloat16
    return jnp.float32


def _make_kernel(layers: int, compute_dtype):
    cd = compute_dtype
    trans_b = (((1,), (1,)), ((), ()))   # A @ B^T (contract both operands on last axis)
    plain = (((1,), (0,)), ((), ()))     # A @ B

    def kernel(h0_ref, x_ref, wh_ref, bh_ref, win_ref, y_ref):
        # Per grid step (TN = batch tile):
        #   h0_ref : (TN, H)   row-major tile of initial_hidden
        #   x_ref  : (TN, Din) row-major tile of input
        #   wh_ref : (H, H)    bh_ref : (H, 1)    win_ref : (H, Din)   (VMEM-resident)
        #   y_ref  : (H, TN)   lane-dense (transposed) output tile
        x = x_ref[...].astype(cd)
        wh = wh_ref[...].astype(cd)
        win = win_ref[...].astype(cd)

        # Loop-invariant term, hoisted: c = W_in @ x^T + b_h   -> (H, TN).
        # Row-major x feeds the MXU directly as a transposed operand (no XLU transpose).
        c = lax.dot_general(win, x, trans_b,
                            preferred_element_type=jnp.float32,
                            precision=lax.Precision.DEFAULT)
        c = (c + bh_ref[...]).astype(cd)          # (H, 1) lane-broadcast, once per tile

        # Layer 1: contract W_h against the row-major h0 tile directly (B^T operand).
        v = lax.dot_general(wh, h0_ref[...].astype(cd), trans_b,
                            preferred_element_type=jnp.float32,
                            precision=lax.Precision.DEFAULT)
        u = jnp.tanh(v.astype(cd) + c)            # (H, TN), lane-dense

        # Layers 2..L: plain W_h @ u recurrence kept in (H, TN).
        # (c / u larger than the vreg file simply live in VMEM; the review's
        #  scratch-for-c tweak is only needed if a bundle dump shows spills.)
        def body(_, u):
            v = lax.dot_general(wh, u, plain,
                                preferred_element_type=jnp.float32,
                                precision=lax.Precision.DEFAULT)
            return jnp.tanh(v.astype(cd) + c)

        u = lax.fori_loop(0, layers - 1, body, u, unroll=True)
        y_ref[...] = u.astype(y_ref.dtype)

    return kernel


@functools.partial(jax.jit, static_argnames=("layers", "compute_dtype"))
def repeated_layers_pallas(initial_hidden, x, w_h, b_h, w_in, *, layers,
                           compute_dtype=None):
    N, D_in = x.shape
    H = w_h.shape[0]

    if layers == 0:
        # forward() returns the (cloned) initial hidden state untouched.
        return initial_hidden

    if compute_dtype is None:
        compute_dtype = _default_compute_dtype()

    # Batch tile: multiple of 128 lanes, capped by _MAX_TILE_N (VMEM) and by
    # ~ceil(N/2) so the "parallel" grid has >=2 steps whenever N allows it.
    tn = min(_MAX_TILE_N, max(_LANE, _round_up(pl.cdiv(N, 2), _LANE)))
    grid = pl.cdiv(N, tn)   # ragged tail block handled by Pallas masking (no jnp.pad)

    bh_col = b_h.reshape(H, 1).astype(jnp.float32)

    out_t = pl.pallas_call(
        _make_kernel(layers, compute_dtype),
        out_shape=jax.ShapeDtypeStruct((H, N), x.dtype),
        grid_spec=pltpu.PrefetchScalarGridSpec(
            num_scalar_prefetch=0,
            grid=(grid,),
            in_specs=[
                pl.BlockSpec((tn, H), lambda i: (i, 0)),      # initial hidden (row-major)
                pl.BlockSpec((tn, D_in), lambda i: (i, 0)),   # input (row-major)
                pl.BlockSpec((H, H), lambda i: (0, 0)),       # W_h  (VMEM-resident)
                pl.BlockSpec((H, 1), lambda i: (0, 0)),       # b_h  (VMEM-resident)
                pl.BlockSpec((H, D_in), lambda i: (0, 0)),    # W_in (VMEM-resident)
            ],
            out_specs=pl.BlockSpec((H, tn), lambda i: (0, i)),
        ),
        compiler_params=pltpu.CompilerParams(
            dimension_semantics=("parallel",),
            vmem_limit_bytes=_VMEM_LIMIT),
    )(initial_hidden, x, w_h, bh_col, w_in)

    # The only wrapper-side layout op left: (H, N) -> (N, H).
    return out_t.T


def repeated_layers_ref(initial_hidden, x, w_h, b_h, w_in, layers):
    """Pure-JAX reference mirroring the PyTorch forward exactly."""
    u = initial_hidden
    for _ in range(layers):
        v = (u @ w_h.T + b_h) + (x @ w_in.T)
        u = jnp.tanh(v)
    return u


if __name__ == "__main__":
    # Small shapes consistent with the module: initial_hidden (N, H), x (N, D_in)
    N, D_in, H, LAYERS = 8, 16, 32, 5

    key = jax.random.PRNGKey(0)
    k = jax.random.split(key, 5)

    # PyTorch-Linear-like init: U(-1/sqrt(fan_in), 1/sqrt(fan_in))
    def lin_init(kk, shape, fan_in):
        b = 1.0 / jnp.sqrt(jnp.float32(fan_in))
        return jax.random.uniform(kk, shape, jnp.float32, -b, b)

    x = jax.random.normal(k[0], (N, D_in), jnp.float32)
    h0 = jax.random.normal(k[1], (N, H), jnp.float32)
    w_h = lin_init(k[2], (H, H), H)              # hiddenWeight (with bias)
    b_h = lin_init(k[3], (H,), H)
    w_in = lin_init(k[4], (H, D_in), D_in)       # inputWeight (no bias)

    y = repeated_layers_pallas(h0, x, w_h, b_h, w_in, layers=LAYERS)
    y = jax.block_until_ready(y)

    y_ref = repeated_layers_ref(h0, x, w_h, b_h, w_in, LAYERS)
    assert y.shape == (N, H)

    # Tolerance tracks the compute path actually selected: bf16 VPU/EUP tanh on
    # v6e/v7x, f32 (single bf16 MXU pass under DEFAULT precision) elsewhere.
    if jnp.dtype(_default_compute_dtype()) == jnp.dtype(jnp.bfloat16):
        atol = rtol = 5e-2
    else:
        atol = rtol = 5e-3
    assert jnp.allclose(y, y_ref, atol=atol, rtol=rtol), "mismatch vs reference"

    print("KERNEL_OK")
</pallas_src>

<mosaic_0001>
module attributes {stable_mosaic.version = 11 : i64} {
  func.func @kernel(%arg0: i32, %arg1: memref<128x32xf32, #tpu.memory_space<vmem>>, %arg2: memref<128x16xf32, #tpu.memory_space<vmem>>, %arg3: memref<32x32xf32, #tpu.memory_space<vmem>>, %arg4: memref<32x1xf32, #tpu.memory_space<vmem>>, %arg5: memref<32x16xf32, #tpu.memory_space<vmem>>, %arg6: memref<32x128xf32, #tpu.memory_space<vmem>>) attributes {dimension_semantics = [#tpu.dimension_semantics<parallel>], iteration_bounds = array<i64: 1>, scalar_prefetch = 0 : i64, scratch_operands = 0 : i64, tpu.core_type = #tpu.core_type<tc>, window_params = [{transform_indices = @transform_0, window_bounds = array<i64: 128, 32>}, {transform_indices = @transform_1, window_bounds = array<i64: 128, 16>}, {pipeline_mode = #tpu.pipeline_mode<synchronous>, transform_indices = @transform_2, window_bounds = array<i64: 32, 32>}, {pipeline_mode = #tpu.pipeline_mode<synchronous>, transform_indices = @transform_3, window_bounds = array<i64: 32, 1>}, {pipeline_mode = #tpu.pipeline_mode<synchronous>, transform_indices = @transform_4, window_bounds = array<i64: 32, 16>}, {transform_indices = @transform_5, window_bounds = array<i64: 32, 128>}]} {
    %c0 = arith.constant 0 : index
    %c0_0 = arith.constant 0 : index
    %0 = vector.load %arg2[%c0, %c0_0] : memref<128x16xf32, #tpu.memory_space<vmem>>, vector<128x16xf32>
    %c0_1 = arith.constant 0 : index
    %c0_2 = arith.constant 0 : index
    %1 = vector.load %arg3[%c0_1, %c0_2] : memref<32x32xf32, #tpu.memory_space<vmem>>, vector<32x32xf32>
    %c0_3 = arith.constant 0 : index
    %c0_4 = arith.constant 0 : index
    %2 = vector.load %arg5[%c0_3, %c0_4] : memref<32x16xf32, #tpu.memory_space<vmem>>, vector<32x16xf32>
    %cst = arith.constant dense<0.000000e+00> : vector<32x128xf32>
    %3 = tpu.matmul %2, %0, %cst {dimension_numbers = #tpu.dot_dimension_numbers<[1], [1], [0], [0], [0, 0, 1, 0], [], []>} : vector<32x16xf32>, vector<128x16xf32>, vector<32x128xf32> -> vector<32x128xf32>
    %c0_5 = arith.constant 0 : index
    %c0_6 = arith.constant 0 : index
    %4 = vector.load %arg4[%c0_5, %c0_6] : memref<32x1xf32, #tpu.memory_space<vmem>>, vector<32x1xf32>
    %5 = vector.broadcast %4 : vector<32x1xf32> to vector<32x128xf32>
    %6 = arith.addf %3, %5 : vector<32x128xf32>
    %c0_7 = arith.constant 0 : index
    %c0_8 = arith.constant 0 : index
    %7 = vector.load %arg1[%c0_7, %c0_8] : memref<128x32xf32, #tpu.memory_space<vmem>>, vector<128x32xf32>
    %cst_9 = arith.constant dense<0.000000e+00> : vector<32x128xf32>
    %8 = tpu.matmul %1, %7, %cst_9 {dimension_numbers = #tpu.dot_dimension_numbers<[1], [1], [0], [0], [0, 0, 1, 0], [], []>} : vector<32x32xf32>, vector<128x32xf32>, vector<32x128xf32> -> vector<32x128xf32>
    %9 = arith.addf %8, %6 : vector<32x128xf32>
    %10 = math.tanh %9 : vector<32x128xf32>
    %c0_i32 = arith.constant 0 : i32
    %cst_10 = arith.constant dense<0.000000e+00> : vector<32x128xf32>
    %11 = tpu.matmul %1, %10, %cst_10 {dimension_numbers = #tpu.dot_dimension_numbers<[1], [0], [0], [1], [0, 0, 1, 1], [], []>} : vector<32x32xf32>, vector<32x128xf32>, vector<32x128xf32> -> vector<32x128xf32>
    %12 = arith.addf %11, %6 : vector<32x128xf32>
    %13 = math.tanh %12 : vector<32x128xf32>
    %c1_i32 = arith.constant 1 : i32
    %cst_11 = arith.constant dense<0.000000e+00> : vector<32x128xf32>
    %14 = tpu.matmul %1, %13, %cst_11 {dimension_numbers = #tpu.dot_dimension_numbers<[1], [0], [0], [1], [0, 0, 1, 1], [], []>} : vector<32x32xf32>, vector<32x128xf32>, vector<32x128xf32> -> vector<32x128xf32>
    %15 = arith.addf %14, %6 : vector<32x128xf32>
    %16 = math.tanh %15 : vector<32x128xf32>
    %c2_i32 = arith.constant 2 : i32
    %cst_12 = arith.constant dense<0.000000e+00> : vector<32x128xf32>
    %17 = tpu.matmul %1, %16, %cst_12 {dimension_numbers = #tpu.dot_dimension_numbers<[1], [0], [0], [1], [0, 0, 1, 1], [], []>} : vector<32x32xf32>, vector<32x128xf32>, vector<32x128xf32> -> vector<32x128xf32>
    %18 = arith.addf %17, %6 : vector<32x128xf32>
    %19 = math.tanh %18 : vector<32x128xf32>
    %c3_i32 = arith.constant 3 : i32
    %cst_13 = arith.constant dense<0.000000e+00> : vector<32x128xf32>
    %20 = tpu.matmul %1, %19, %cst_13 {dimension_numbers = #tpu.dot_dimension_numbers<[1], [0], [0], [1], [0, 0, 1, 1], [], []>} : vector<32x32xf32>, vector<32x128xf32>, vector<32x128xf32> -> vector<32x128xf32>
    %21 = arith.addf %20, %6 : vector<32x128xf32>
    %22 = math.tanh %21 : vector<32x128xf32>
    %c0_14 = arith.constant 0 : index
    %c0_15 = arith.constant 0 : index
    %23 = vector.load %arg6[%c0_14, %c0_15] : memref<32x128xf32, #tpu.memory_space<vmem>>, vector<32x128xf32>
    tpu.vector_store %arg6[%c0_14, %c0_15], %22 {strides = array<i32>} : memref<32x128xf32, #tpu.memory_space<vmem>>, vector<32x128xf32>,
    return
  }
  func.func @transform_0(%arg0: i32) -> (i32, i32) {
    %c0_i32 = arith.constant 0 : i32
    %c0_i32_0 = arith.constant 0 : i32
    return %arg0, %c0_i32 : i32, i32
  }
  func.func @transform_1(%arg0: i32) -> (i32, i32) {
    %c0_i32 = arith.constant 0 : i32
    %c0_i32_0 = arith.constant 0 : i32
    return %arg0, %c0_i32 : i32, i32
  }
  func.func @transform_2(%arg0: i32) -> (i32, i32) {
    %c0_i32 = arith.constant 0 : i32
    %c0_i32_0 = arith.constant 0 : i32
    %c0_i32_1 = arith.constant 0 : i32
    return %c0_i32, %c0_i32_0 : i32, i32
  }
  func.func @transform_3(%arg0: i32) -> (i32, i32) {
    %c0_i32 = arith.constant 0 : i32
    %c0_i32_0 = arith.constant 0 : i32
    %c0_i32_1 = arith.constant 0 : i32
    return %c0_i32, %c0_i32_0 : i32, i32
  }
  func.func @transform_4(%arg0: i32) -> (i32, i32) {
    %c0_i32 = arith.constant 0 : i32
    %c0_i32_0 = arith.constant 0 : i32
    %c0_i32_1 = arith.constant 0 : i32
    return %c0_i32, %c0_i32_0 : i32, i32
  }
  func.func @transform_5(%arg0: i32) -> (i32, i32) {
    %c0_i32 = arith.constant 0 : i32
    %c0_i32_0 = arith.constant 0 : i32
    return %c0_i32, %arg0 : i32, i32
  }
}

</mosaic_0001>

<bundles_post_ra>
// kernel: repeated_layers_pallas.1
= control target key start
LH: loop header
LB: loop body
LE: loop exit
PB: predicated region body
PF: predicated region fallthrough
CT: control target
= control target key end

     0   :  { %vm68_vm0 = vcmask 130048   ;;  %vm230_vm1 = vcmask 261120   ;;  %v1175_v3 = vmov 0   ;;  %s1506_s1 = inlined_call_operand.vmem [shape: f32[8,16], index: 1, kind: input, shape index: {}]   ;;  %s1507_s0 = inlined_call_operand.vmem [shape: f32[8,32], index: 0, kind: input, shape index: {}]   ;;  %s1508_s4 = inlined_call_operand.vmem [shape: f32[32,16], index: 4, kind: input, shape index: {}]   ;;  %s1509_s2 = inlined_call_operand.vmem [shape: f32[32,32], index: 2, kind: input, shape index: {}]   ;;  %s1510_s3 = inlined_call_operand.vmem [shape: f32[32,1], index: 3, kind: input, shape index: {}]   ;;  %s1511_s5 = inlined_call_operand.vmem [shape: f32[32,8], index: 5, kind: output, shape index: {}]  }
   0x1   :  { %v20_v0 = vld [vmem:[%s1506_s1] sm:$0xff]  ;;  %v21_v1 = vld [vmem:[%s1506_s1 + $0x8] sm:$0xff]  ;;  %vm1214_vm2 = vmpackc.low %vm68_vm0, %vm68_vm0  ;;  %1133 = vset.pattern.permute.xlu0 %v1175_v3  ;;  %1134 = vset.pattern.permute.xlu1 %v1175_v3 }
   0x2   :  { %v1004_v4 = vpack.c.bf16 %v21_v1, %v20_v0  ;;  %v214_v5 = vld [vmem:[%s1507_s0] sm:$0xff]  ;;  %v215_v6 = vld [vmem:[%s1507_s0 + $0x8] sm:$0xff]  ;;  %vm1226_vm3 = vmpackc.low %vm230_vm1, %vm230_vm1 }
   0x3   :  { %v1052_v8 = vpack.c.bf16 %v215_v6, %v214_v5  ;;  %v22_v9 = vld [vmem:[%s1506_s1 + $0x10] sm:$0xff]  ;;  %v23_v10 = vld [vmem:[%s1506_s1 + $0x18] sm:$0xff]  ;;  %v24_v15 = vld [vmem:[%s1506_s1 + $0x20] sm:$0xff] }
   0x4   :  { %v216_v11 = vld [vmem:[%s1507_s0 + $0x10] sm:$0xff]  ;;  %1006 = vmatprep.subr.msk.bf16.mxu0 %vm1214_vm2, %v1004_v4  ;;  %v1010_v12 = vpack.c.bf16 %v23_v10, %v22_v9  ;;  %v217_v13 = vld [vmem:[%s1507_s0 + $0x18] sm:$0xff]  ;;  %v25_v16 = vld [vmem:[%s1506_s1 + $0x28] sm:$0xff] }
   0x5   :  { %1009 = vmatpush3.bf16.xpose.msk.msra.mxu0 %vm1214_vm2, %v1004_v4  ;;  %1054 = vmatprep.subr.msk.bf16.mxu1 %vm1226_vm3, %v1052_v8  ;;  %v1058_v14 = vpack.c.bf16 %v217_v13, %v216_v11  ;;  %v218_v17 = vld [vmem:[%s1507_s0 + $0x20] sm:$0xff]  ;;  %v219_v18 = vld [vmem:[%s1507_s0 + $0x28] sm:$0xff]  ;;  %v1016_v19 = vpack.c.bf16 %v25_v16, %v24_v15  ;;  %v26_v23 = vld [vmem:[%s1506_s1 + $0x30] sm:$0xff] }
   0x6   :  { %1057 = vmatpush3.bf16.xpose.msk.msra.mxu1 %vm1226_vm3, %v1052_v8  ;;  %1012 = vmatprep.subr.msk.bf16.mxu0 %vm1214_vm2, %v1010_v12  ;;  %v1064_v20 = vpack.c.bf16 %v219_v18, %v218_v17  ;;  %v40_v21 = vld [vmem:[%s1508_s4] sm:$0xff]  ;;  %v27_v24 = vld [vmem:[%s1506_s1 + $0x38] sm:$0xff]  ;;  %v46_v26 = vld [vmem:[%s1510_s3 + $0x10] sm:$0xff] }
   0x7   :  { %1060 = vmatprep.subr.msk.bf16.mxu1 %vm1226_vm3, %v1058_v14  ;;  %904 = vmatprep.mubr.msk.f32.mxu0 %vm68_vm0, %v40_v21  ;;  %v1275_v22 = vld [vmem:[%s1509_s2] sm:$0xff]  ;;  %v220_v27 = vld [vmem:[%s1507_s0 + $0x30] sm:$0xff]  ;;  %v221_v28 = vld [vmem:[%s1507_s0 + $0x38] sm:$0xff]  ;;  %v1022_v31 = vpack.c.bf16 %v27_v24, %v26_v23 }
   0x8   :  { %942 = vmatprep.mubr.msk.f32.mxu1 %vm230_vm1, %v1275_v22  ;;  %v44_v25 = vld [vmem:[%s1510_s3] sm:$0xff]  ;;  %60 = vperm.xlu1 %1134, %v46_v26   ;;  %v45_v29 = vld [vmem:[%s1510_s3 + $0x8] sm:$0xff]  ;;  %v47_v30 = vld [vmem:[%s1510_s3 + $0x18] sm:$0xff]  ;;  %v1070_v32 = vpack.c.bf16 %v221_v28, %v220_v27 }
   0x9   :  { %50 = vperm.xlu0 %1133, %v44_v25   ;;  %v28_v33 = vld [vmem:[%s1506_s1 + $0x40] sm:$0xff]  ;;  %v29_v34 = vld [vmem:[%s1506_s1 + $0x48] sm:$0xff]  ;;  %v30_v39 = vld [vmem:[%s1506_s1 + $0x50] sm:$0xff] }
   0xa   :  { %v222_v35 = vld [vmem:[%s1507_s0 + $0x40] sm:$0xff]  ;;  %v223_v36 = vld [vmem:[%s1507_s0 + $0x48] sm:$0xff]  ;;  %v1028_v37 = vpack.c.bf16 %v29_v34, %v28_v33  ;;  %v31_v40 = vld [vmem:[%s1506_s1 + $0x58] sm:$0xff] }
   0xb   :  { %v1076_v38 = vpack.c.bf16 %v223_v36, %v222_v35  ;;  %v224_v41 = vld [vmem:[%s1507_s0 + $0x50] sm:$0xff]  ;;  %v225_v42 = vld [vmem:[%s1507_s0 + $0x58] sm:$0xff]  ;;  %v1034_v43 = vpack.c.bf16 %v31_v40, %v30_v39  ;;  %v32_v45 = vld [vmem:[%s1506_s1 + $0x60] sm:$0xff] }
   0xc   :  { %65 = vperm.xlu1 %1134, %v47_v30   ;;  %v1082_v44 = vpack.c.bf16 %v225_v42, %v224_v41  ;;  %v33_v46 = vld [vmem:[%s1506_s1 + $0x68] sm:$0xff]  ;;  %v226_v47 = vld [vmem:[%s1507_s0 + $0x60] sm:$0xff]  ;;  %v34_v51 = vld [vmem:[%s1506_s1 + $0x70] sm:$0xff] }
   0xd   :  { %1015 = vmatpush3.bf16.xpose.msk.msra.mxu0 %vm1214_vm2, %v1010_v12  ;;  %55 = vperm.xlu0 %1133, %v45_v29   ;;  %v227_v48 = vld [vmem:[%s1507_s0 + $0x68] sm:$0xff]  ;;  %v1040_v49 = vpack.c.bf16 %v33_v46, %v32_v45  ;;  %v35_v52 = vld [vmem:[%s1506_s1 + $0x78] sm:$0xff]  ;;  %v228_v53 = vld [vmem:[%s1507_s0 + $0x70] sm:$0xff] }
   0xe   :  { %1063 = vmatpush3.bf16.xpose.msk.msra.mxu1 %vm1226_vm3, %v1058_v14  ;;  %1018 = vmatprep.subr.msk.bf16.mxu0 %vm1214_vm2, %v1016_v19  ;;  %v1088_v50 = vpack.c.bf16 %v227_v48, %v226_v47  ;;  %v229_v54 = vld [vmem:[%s1507_s0 + $0x78] sm:$0xff]  ;;  %v1046_v55 = vpack.c.bf16 %v35_v52, %v34_v51  ;;  %v41_v57 = vld [vmem:[%s1508_s4 + $0x8] sm:$0xff]  ;;  %v42_v59 = vld [vmem:[%s1508_s4 + $0x10] sm:$0xff] }
   0xf   :  { %1066 = vmatprep.subr.msk.bf16.mxu1 %vm1226_vm3, %v1064_v20  ;;  %v1094_v56 = vpack.c.bf16 %v229_v54, %v228_v53  ;;  %v1407_v58 = vld [vmem:[%s1509_s2 + $0x8] sm:$0xff]  ;;  %v1415_v60 = vld [vmem:[%s1509_s2 + $0x10] sm:$0xff]  ;;  %v43_v61 = vld [vmem:[%s1508_s4 + $0x18] sm:$0xff] }
  0x10   :  { %v1429_v62 = vld [vmem:[%s1509_s2 + $0x18] sm:$0xff] }
  0x15   :  { %1021 = vmatpush3.bf16.xpose.msk.msra.mxu0 %vm1214_vm2, %v1016_v19 }
  0x16   :  { %1069 = vmatpush3.bf16.xpose.msk.msra.mxu1 %vm1226_vm3, %v1064_v20  ;;  %1024 = vmatprep.subr.msk.bf16.mxu0 %vm1214_vm2, %v1022_v31 }
  0x17   :  { %1072 = vmatprep.subr.msk.bf16.mxu1 %vm1226_vm3, %v1070_v32 }
  0x1d   :  { %1027 = vmatpush3.bf16.xpose.msk.msra.mxu0 %vm1214_vm2, %v1022_v31 }
  0x1e   :  { %1075 = vmatpush3.bf16.xpose.msk.msra.mxu1 %vm1226_vm3, %v1070_v32  ;;  %1030 = vmatprep.subr.msk.bf16.mxu0 %vm1214_vm2, %v1028_v37 }
  0x1f   :  { %1078 = vmatprep.subr.msk.bf16.mxu1 %vm1226_vm3, %v1076_v38 }
  0x25   :  { %1033 = vmatpush3.bf16.xpose.msk.msra.mxu0 %vm1214_vm2, %v1028_v37 }
  0x26   :  { %1081 = vmatpush3.bf16.xpose.msk.msra.mxu1 %vm1226_vm3, %v1076_v38  ;;  %1036 = vmatprep.subr.msk.bf16.mxu0 %vm1214_vm2, %v1034_v43 }
  0x27   :  { %1084 = vmatprep.subr.msk.bf16.mxu1 %vm1226_vm3, %v1082_v44 }
  0x2d   :  { %1039 = vmatpush3.bf16.xpose.msk.msra.mxu0 %vm1214_vm2, %v1034_v43 }
  0x2e   :  { %1087 = vmatpush3.bf16.xpose.msk.msra.mxu1 %vm1226_vm3, %v1082_v44  ;;  %1042 = vmatprep.subr.msk.bf16.mxu0 %vm1214_vm2, %v1040_v49 }
  0x2f   :  { %1090 = vmatprep.subr.msk.bf16.mxu1 %vm1226_vm3, %v1088_v50 }
  0x35   :  { %1045 = vmatpush3.bf16.xpose.msk.msra.mxu0 %vm1214_vm2, %v1040_v49 }
  0x36   :  { %1093 = vmatpush3.bf16.xpose.msk.msra.mxu1 %vm1226_vm3, %v1088_v50  ;;  %1048 = vmatprep.subr.msk.bf16.mxu0 %vm1214_vm2, %v1046_v55 }
  0x37   :  { %1096 = vmatprep.subr.msk.bf16.mxu1 %vm1226_vm3, %v1094_v56 }
  0x3d   :  { %1051 = vmatpush3.bf16.xpose.msk.msra.mxu0 %vm1214_vm2, %v1046_v55 }
  0x3e   :  { %1099 = vmatpush3.bf16.xpose.msk.msra.mxu1 %vm1226_vm3, %v1094_v56 }
  0x44   :  { %905 = vmatmul.mubr.msk.f32.vlgmr.msra.gmra.mrb[0].mxu0 %vm68_vm0, %v41_v57 }
  0x45   :  { %943 = vmatmul.mubr.msk.f32.vlgmr.msra.gmra.mrb[0].mxu1 %vm230_vm1, %v1407_v58  ;;  %907 = vmatprep.mubr.msk.f32.mxu0 %vm68_vm0, %v42_v59 }
  0x46   :  { %945 = vmatprep.mubr.msk.f32.mxu1 %vm230_vm1, %v1415_v60 }
  0x48   :  { %908 = vmatmul.mubr.msk.f32.gmra.mrb[2].mxu0 %vm68_vm0, %v43_v61 }
  0x49   :  { %946 = vmatmul.mubr.msk.f32.gmra.mrb[2].mxu1 %vm230_vm1, %v1429_v62  ;;  %956 = vmatprep.mubr.msk.f32.mxu0 %vm230_vm1, %v1275_v22 }
  0x4a   :  { %970 = vmatprep.mubr.msk.f32.mxu1 %vm230_vm1, %v1275_v22 }
  0x87   :  { %v61_v0 = vpop.permute.xlu1 %60 }
  0x88   :  { %v51_v63 = vpop.permute.xlu0 %50 }
  0x8b   :  { %v66_v9 = vpop.permute.xlu1 %65 }
  0x8c   :  { %v56_v1 = vpop.permute.xlu0 %55 }
 0x117   :  { %v906_v2 = vpop.f32.mrb[0].mxu0 }
 0x118   :  { %v1438_v3 = vadd.f32 %v906_v2, %v56_v1  ;;  %v195_v4 = vpop.f32.mrb[1].mxu0  ;;  %v944_v5 = vpop.f32.mrb[0].mxu1 }
 0x119   :  { %v1440_v6 = vadd.f32 %v195_v4, %v51_v63  ;;  %v357_v7 = vpop.f32.mrb[1].mxu1 }
 0x11a   :  { %v363_v8 = vadd.f32 %v944_v5, %v1438_v3 }
 0x11b   :  { %v358_v10 = vadd.f32 %v357_v7, %v1440_v6  ;;  %v909_v11 = vpop.f32.mrb[2].mxu0 }
 0x11c   :  { %1135 = vtanh.f32 %v363_v8  ;;  %v1444_v12 = vadd.f32 %v909_v11, %v66_v9  ;;  %v205_v13 = vpop.f32.mrb[3].mxu0  ;;  %v947_v14 = vpop.f32.mrb[2].mxu1 }
 0x11d   :  { %1137 = vtanh.f32 %v358_v10  ;;  %v1446_v15 = vadd.f32 %v205_v13, %v61_v0  ;;  %v367_v16 = vpop.f32.mrb[3].mxu1 }
 0x11e   :  { %v373_v17 = vadd.f32 %v947_v14, %v1444_v12 }
 0x11f   :  { %v368_v18 = vadd.f32 %v367_v16, %v1446_v15 }
 0x120   :  { %1139 = vtanh.f32 %v373_v17 }
 0x121   :  { %1141 = vtanh.f32 %v368_v18 }
 0x126   :  { %v1136_v19 = vpop.eup %1135 }
 0x127   :  { %v1138_v20 = vpop.eup %1137 }
 0x128   :  { %v1100_v21 = vpack.c.bf16 %v1136_v19, %v1138_v20 }
 0x12a   :  { %v1140_v23 = vpop.eup %1139  ;;  %1101 = vmatprep.subr.bf16.mxu0 %v1100_v21 }
 0x12b   :  { %v1142_v24 = vpop.eup %1141  ;;  %1103 = vmatpush3.bf16.msra.mxu0 %v1100_v21 }
 0x12c   :  { %v1104_v25 = vpack.c.bf16 %v1140_v23, %v1142_v24 }
 0x12e   :  { %1105 = vmatprep.subr.bf16.mxu0 %v1104_v25 }
 0x12f   :  { %1107 = vmatpush3.bf16.msra.mxu0 %v1104_v25 }
 0x132   :  { %957 = vmatmul.mubr.msk.f32.vlgmr.msra.gmra.mrb[4].mxu0 %vm230_vm1, %v1407_v58 }
 0x133   :  { %959 = vmatprep.mubr.msk.f32.mxu0 %vm230_vm1, %v1415_v60 }
 0x136   :  { %960 = vmatmul.mubr.msk.f32.gmra.mrb[6].mxu0 %vm230_vm1, %v1429_v62 }
 0x137   :  { %984 = vmatprep.mubr.msk.f32.mxu0 %vm230_vm1, %v1275_v22 }
 0x205   :  { %v958_v26 = vpop.f32.mrb[4].mxu0 }
 0x206   :  { %v452_v27 = vadd.f32 %v958_v26, %v1438_v3  ;;  %v446_v28 = vpop.f32.mrb[5].mxu0 }
 0x207   :  { %v447_v29 = vadd.f32 %v446_v28, %v1440_v6 }
 0x208   :  { %1143 = vtanh.f32 %v452_v27 }
 0x209   :  { %1145 = vtanh.f32 %v447_v29  ;;  %v961_v30 = vpop.f32.mrb[6].mxu0 }
 0x20a   :  { %v462_v31 = vadd.f32 %v961_v30, %v1444_v12  ;;  %v456_v32 = vpop.f32.mrb[7].mxu0 }
 0x20b   :  { %v457_v33 = vadd.f32 %v456_v32, %v1446_v15 }
 0x20c   :  { %1147 = vtanh.f32 %v462_v31 }
 0x20d   :  { %1149 = vtanh.f32 %v457_v33 }
 0x212   :  { %v1144_v34 = vpop.eup %1143 }
 0x213   :  { %v1146_v35 = vpop.eup %1145 }
 0x214   :  { %v1108_v36 = vpack.c.bf16 %v1144_v34, %v1146_v35 }
 0x216   :  { %v1148_v37 = vpop.eup %1147  ;;  %1109 = vmatprep.subr.bf16.mxu1 %v1108_v36 }
 0x217   :  { %v1150_v38 = vpop.eup %1149  ;;  %1111 = vmatpush3.bf16.msra.mxu1 %v1108_v36 }
 0x218   :  { %v1112_v39 = vpack.c.bf16 %v1148_v37, %v1150_v38 }
 0x21a   :  { %1113 = vmatprep.subr.bf16.mxu1 %v1112_v39 }
 0x21b   :  { %1115 = vmatpush3.bf16.msra.mxu1 %v1112_v39 }
 0x21e   :  { %971 = vmatmul.mubr.msk.f32.vlgmr.msra.gmra.mrb[4].mxu1 %vm230_vm1, %v1407_v58 }
 0x21f   :  { %973 = vmatprep.mubr.msk.f32.mxu1 %vm230_vm1, %v1415_v60 }
 0x222   :  { %974 = vmatmul.mubr.msk.f32.gmra.mrb[6].mxu1 %vm230_vm1, %v1429_v62 }
 0x223   :  { %998 = vmatprep.mubr.msk.f32.mxu1 %vm230_vm1, %v1275_v22 }
 0x2f1   :  { %v972_v40 = vpop.f32.mrb[4].mxu1 }
 0x2f2   :  { %v541_v41 = vadd.f32 %v972_v40, %v1438_v3  ;;  %v535_v42 = vpop.f32.mrb[5].mxu1 }
 0x2f3   :  { %v536_v43 = vadd.f32 %v535_v42, %v1440_v6 }
 0x2f4   :  { %1151 = vtanh.f32 %v541_v41 }
 0x2f5   :  { %1153 = vtanh.f32 %v536_v43  ;;  %v975_v44 = vpop.f32.mrb[6].mxu1 }
 0x2f6   :  { %v551_v45 = vadd.f32 %v975_v44, %v1444_v12  ;;  %v545_v46 = vpop.f32.mrb[7].mxu1 }
 0x2f7   :  { %v546_v47 = vadd.f32 %v545_v46, %v1446_v15 }
 0x2f8   :  { %1155 = vtanh.f32 %v551_v45 }
 0x2f9   :  { %1157 = vtanh.f32 %v546_v47 }
 0x2fe   :  { %v1152_v48 = vpop.eup %1151 }
 0x2ff   :  { %v1154_v49 = vpop.eup %1153 }
 0x300   :  { %v1116_v50 = vpack.c.bf16 %v1152_v48, %v1154_v49 }
 0x302   :  { %v1156_v22 = vpop.eup %1155  ;;  %1117 = vmatprep.subr.bf16.mxu0 %v1116_v50 }
 0x303   :  { %v1158_v51 = vpop.eup %1157  ;;  %1119 = vmatpush3.bf16.msra.mxu0 %v1116_v50 }
 0x304   :  { %v1120_v52 = vpack.c.bf16 %v1156_v22, %v1158_v51 }
 0x306   :  { %1121 = vmatprep.subr.bf16.mxu0 %v1120_v52 }
 0x307   :  { %1123 = vmatpush3.bf16.msra.mxu0 %v1120_v52 }
 0x30a   :  { %985 = vmatmul.mubr.msk.f32.vlgmr.msra.gmra.mrb[8].mxu0 %vm230_vm1, %v1407_v58 }
 0x30b   :  { %987 = vmatprep.mubr.msk.f32.mxu0 %vm230_vm1, %v1415_v60 }
 0x30e   :  { %988 = vmatmul.mubr.msk.f32.gmra.mrb[10].mxu0 %vm230_vm1, %v1429_v62 }
 0x3dd   :  { %v986_v53 = vpop.f32.mrb[8].mxu0 }
 0x3de   :  { %v630_v54 = vadd.f32 %v986_v53, %v1438_v3  ;;  %v624_v55 = vpop.f32.mrb[9].mxu0 }
 0x3df   :  { %v625_v56 = vadd.f32 %v624_v55, %v1440_v6 }
 0x3e0   :  { %1159 = vtanh.f32 %v630_v54 }
 0x3e1   :  { %1161 = vtanh.f32 %v625_v56  ;;  %v989_v57 = vpop.f32.mrb[10].mxu0 }
 0x3e2   :  { %v640_v59 = vadd.f32 %v989_v57, %v1444_v12  ;;  %v634_v61 = vpop.f32.mrb[11].mxu0 }
 0x3e3   :  { %v635_v63 = vadd.f32 %v634_v61, %v1446_v15 }
 0x3e4   :  { %1163 = vtanh.f32 %v640_v59 }
 0x3e5   :  { %1165 = vtanh.f32 %v635_v63 }
 0x3ea   :  { %v1160_v0 = vpop.eup %1159 }
 0x3eb   :  { %v1162_v1 = vpop.eup %1161 }
 0x3ec   :  { %v1124_v2 = vpack.c.bf16 %v1160_v0, %v1162_v1 }
 0x3ee   :  { %v1164_v4 = vpop.eup %1163  ;;  %1125 = vmatprep.subr.bf16.mxu1 %v1124_v2 }
 0x3ef   :  { %v1166_v5 = vpop.eup %1165  ;;  %1127 = vmatpush3.bf16.msra.mxu1 %v1124_v2 }
 0x3f0   :  { %v1128_v7 = vpack.c.bf16 %v1164_v4, %v1166_v5 }
 0x3f2   :  { %1129 = vmatprep.subr.bf16.mxu1 %v1128_v7 }
 0x3f3   :  { %1131 = vmatpush3.bf16.msra.mxu1 %v1128_v7 }
 0x3f6   :  { %999 = vmatmul.mubr.msk.f32.vlgmr.msra.gmra.mrb[8].mxu1 %vm230_vm1, %v1407_v58 }
 0x3f7   :  { %1001 = vmatprep.mubr.msk.f32.mxu1 %vm230_vm1, %v1415_v60 }
 0x3fa   :  { %1002 = vmatmul.mubr.msk.f32.gmra.mrb[10].mxu1 %vm230_vm1, %v1429_v62 }
 0x4c9   :  { %v1000_v8 = vpop.f32.mrb[8].mxu1 }
 0x4ca   :  { %v719_v9 = vadd.f32 %v1000_v8, %v1438_v3  ;;  %v713_v10 = vpop.f32.mrb[9].mxu1 }
 0x4cb   :  { %v714_v11 = vadd.f32 %v713_v10, %v1440_v6 }
 0x4cc   :  { %1167 = vtanh.f32 %v719_v9 }
 0x4cd   :  { %1169 = vtanh.f32 %v714_v11  ;;  %v1003_v13 = vpop.f32.mrb[10].mxu1 }
 0x4ce   :  { %v729_v14 = vadd.f32 %v1003_v13, %v1444_v12  ;;  %v723_v16 = vpop.f32.mrb[11].mxu1 }
 0x4cf   :  { %v724_v58 = vadd.f32 %v723_v16, %v1446_v15 }
 0x4d0   :  { %1171 = vtanh.f32 %v729_v14 }
 0x4d1   :  { %1173 = vtanh.f32 %v724_v58 }
 0x4d6   :  { %v1168_v60 = vpop.eup %1167 }
 0x4d7   :  { %v1170_v17 = vpop.eup %1169  ;;  %737 = vst [vmem:[%s1511_s5 + $0x8] sm:$0xff] %v1168_v60 }
 0x4d8   :  { %736 = vst [vmem:[%s1511_s5] sm:$0xff] %v1170_v17 }
 0x4da   :  { %v1172_v62 = vpop.eup %1171 }
 0x4db   :  { %v1174_v3 = vpop.eup %1173  ;;  %739 = vst [vmem:[%s1511_s5 + $0x18] sm:$0xff] %v1172_v62 }
 0x4dc   :  { %738 = vst [vmem:[%s1511_s5 + $0x10] sm:$0xff] %v1174_v3 }

</bundles_post_ra>
